<compile_context>
chip_gen: v5e
topology: v5e:2x2
jax: 0.10.0
libtpu: 0.0.40
codegen_flags: <defaults>
</compile_context>

<pallas_src>
import functools

import jax
import jax.numpy as jnp
from jax.experimental import pallas as pl
from jax.experimental.pallas import tpu as pltpu


def _round_up(n: int, m: int) -> int:
    return (n + m - 1) // m * m


def _choose_tm(M: int, tm_max: int = 1024, min_steps: int = 2) -> int:
    """Row-tile size. Small M: one full-extent block (always layout-legal).
    Mid/large M: multiple-of-8 tiles, capped so the grid has >= min_steps steps
    (keeps both v7x TensorCores busy) and each tile stays <= tm_max."""
    if M <= 512:
        return M
    return min(tm_max, _round_up(pl.cdiv(M, min_steps), 8))


def _patch_embed_kernel(x_ref, w_ref, b_ref, o_ref):
    # x: (tm, K) f32 from HBM, cast to bf16 in-register (VPU, hidden under DMA)
    # w: (K, E) bf16, VMEM-resident across the whole grid
    # b: (1, E) f32, VMEM-resident
    acc = jnp.dot(
        x_ref[...].astype(jnp.bfloat16),
        w_ref[...],
        preferred_element_type=jnp.float32,
    )
    o_ref[...] = (acc + b_ref[...]).astype(o_ref.dtype)


def prepare_patch_embed_params(weight, *, compute_dtype=jnp.bfloat16):
    """One-time weight prep (do at init, NOT per forward call).

    weight: (E, HW, p) -- PyTorch Conv1d layout (out, in, kernel)
    Returns w_flat: (K, E) in `compute_dtype` with K = p*HW and
    w_flat[j*HW + i, o] = weight[o, i, j] (matches x.reshape(M, K) columns).
    No padding: Mosaic pads the contraction dim inside VMEM for free.
    """
    E, HW, p = weight.shape
    K = p * HW
    w_flat = jnp.transpose(weight, (2, 1, 0)).reshape(K, E)
    return w_flat.astype(compute_dtype)


def patch_embed_spe(x, w_flat, bias, patch_size, embed_dim, *,
                    tm_max=1024, out_dtype=jnp.float32):
    """x: (B, C, H, W). w_flat: output of prepare_patch_embed_params.
    bias: (E,). Returns (B, C // patch_size, embed_dim)."""
    B, C, H, W = x.shape
    HW = H * W
    p = patch_size
    assert C % p == 0, "sequence length C must be divisible by patch_size"
    T = C // p
    K = p * HW
    M = B * T
    assert w_flat.shape == (K, embed_dim)

    # Free views — zero extra HBM traffic.
    x2d = x.reshape(M, K)
    b2d = bias.reshape(1, embed_dim).astype(jnp.float32)

    tm = _choose_tm(M, tm_max)
    grid = (pl.cdiv(M, tm),)

    out_bytes = jnp.dtype(out_dtype).itemsize
    cost = pl.CostEstimate(
        flops=2 * M * K * embed_dim,
        transcendentals=0,
        bytes_accessed=(M * K * x.dtype.itemsize
                        + M * embed_dim * out_bytes
                        + K * embed_dim * 2
                        + embed_dim * 4),
    )

    out = pl.pallas_call(
        _patch_embed_kernel,
        out_shape=jax.ShapeDtypeStruct((M, embed_dim), out_dtype),
        grid=grid,
        in_specs=[
            pl.BlockSpec((tm, K), lambda i: (i, 0)),            # row tiles of x
            pl.BlockSpec((K, embed_dim), lambda i: (0, 0)),     # weight resident
            pl.BlockSpec((1, embed_dim), lambda i: (0, 0)),     # bias resident
        ],
        out_specs=pl.BlockSpec((tm, embed_dim), lambda i: (i, 0)),
        compiler_params=pltpu.CompilerParams(
            dimension_semantics=("parallel",),   # rows split across v7x's 2 TCs
            vmem_limit_bytes=32 << 20,           # safe on v5e/v6e/v7x
        ),
        cost_estimate=cost,
    )(x2d, w_flat, b2d)

    # (M, E) is row-major-contiguous -> free reshape to (B, T, E).
    return out.reshape(B, T, embed_dim)


def _reference_forward(x, weight, bias, patch_size):
    """Pure-JAX f32 reference of the PyTorch module forward."""
    B, C, H, W = x.shape
    x_seq = jnp.transpose(x.reshape(B, C, H * W), (0, 2, 1))       # (B, HW, C)
    ref = jax.lax.conv_general_dilated(
        x_seq, weight, window_strides=(patch_size,), padding="VALID",
        dimension_numbers=("NCH", "OIH", "NCH"),
    ) + bias[None, :, None]                                         # (B, E, T)
    return jnp.transpose(ref, (0, 2, 1))                            # (B, T, E)


if __name__ == "__main__":
    # Module defaults: img_size=(9, 9) => Conv1d in_channels = 81,
    # patch_size=2, embed_dim=64.
    img_size = (9, 9)
    patch_size = 2
    embed_dim = 64
    H, W = img_size

    key = jax.random.PRNGKey(0)
    kx, kw, kb, kx2 = jax.random.split(key, 4)
    weight = jax.random.normal(kw, (embed_dim, H * W, patch_size),
                               dtype=jnp.float32) * 0.02
    bias = jax.random.normal(kb, (embed_dim,), dtype=jnp.float32) * 0.02

    # One-time weight prep (flattened, bf16).
    w_flat = jax.block_until_ready(prepare_patch_embed_params(weight))

    fwd = jax.jit(functools.partial(
        patch_embed_spe, patch_size=patch_size, embed_dim=embed_dim))

    ok = True

    # Small default-ish shape (single full-extent tile).
    B, C = 2, 8                                  # Conv1d length C must be even
    x = jax.random.normal(kx, (B, C, H, W), dtype=jnp.float32)
    out = jax.block_until_ready(fwd(x, w_flat, bias))
    ref = _reference_forward(x, weight, bias, patch_size)
    ok &= out.shape == (B, C // patch_size, embed_dim)
    ok &= bool(jnp.allclose(out, ref, atol=2e-2, rtol=2e-2))  # bf16 operands

    # Larger shape: 2 grid steps + ragged (masked) last row block (M=600).
    B2, C2 = 2, 600
    x2 = jax.random.normal(kx2, (B2, C2, H, W), dtype=jnp.float32)
    out2 = jax.block_until_ready(fwd(x2, w_flat, bias))
    ref2 = _reference_forward(x2, weight, bias, patch_size)
    ok &= out2.shape == (B2, C2 // patch_size, embed_dim)
    ok &= bool(jnp.allclose(out2, ref2, atol=2e-2, rtol=2e-2))

    assert ok, "mismatch vs reference"
    print("KERNEL_OK")
</pallas_src>

<mosaic_0001>
module attributes {stable_mosaic.version = 11 : i64} {
  func.func @_patch_embed_kernel(%arg0: i32, %arg1: memref<8x162xf32, #tpu.memory_space<vmem>>, %arg2: memref<162x64xbf16, #tpu.memory_space<vmem>>, %arg3: memref<1x64xf32, #tpu.memory_space<vmem>>, %arg4: memref<8x64xf32, #tpu.memory_space<vmem>>) attributes {dimension_semantics = [#tpu.dimension_semantics<parallel>], iteration_bounds = array<i64: 1>, scalar_prefetch = 0 : i64, scratch_operands = 0 : i64, tpu.core_type = #tpu.core_type<tc>, window_params = [{transform_indices = @transform_0, window_bounds = array<i64: 8, 162>}, {pipeline_mode = #tpu.pipeline_mode<synchronous>, transform_indices = @transform_1, window_bounds = array<i64: 162, 64>}, {pipeline_mode = #tpu.pipeline_mode<synchronous>, transform_indices = @transform_2, window_bounds = array<i64: 1, 64>}, {transform_indices = @transform_3, window_bounds = array<i64: 8, 64>}]} {
    %c0 = arith.constant 0 : index
    %c0_0 = arith.constant 0 : index
    %0 = vector.load %arg1[%c0, %c0_0] : memref<8x162xf32, #tpu.memory_space<vmem>>, vector<8x162xf32>
    %1 = arith.truncf %0 : vector<8x162xf32> to vector<8x162xbf16>
    %c0_1 = arith.constant 0 : index
    %c0_2 = arith.constant 0 : index
    %2 = vector.load %arg2[%c0_1, %c0_2] : memref<162x64xbf16, #tpu.memory_space<vmem>>, vector<162x64xbf16>
    %cst = arith.constant dense<0.000000e+00> : vector<8x64xf32>
    %3 = tpu.matmul %1, %2, %cst {dimension_numbers = #tpu.dot_dimension_numbers<[1], [0], [0], [1], [0, 0, 1, 1], [], []>} : vector<8x162xbf16>, vector<162x64xbf16>, vector<8x64xf32> -> vector<8x64xf32>
    %c0_3 = arith.constant 0 : index
    %c0_4 = arith.constant 0 : index
    %4 = vector.load %arg3[%c0_3, %c0_4] : memref<1x64xf32, #tpu.memory_space<vmem>>, vector<1x64xf32>
    %5 = vector.broadcast %4 : vector<1x64xf32> to vector<8x64xf32>
    %6 = arith.addf %3, %5 : vector<8x64xf32>
    %c0_5 = arith.constant 0 : index
    %c0_6 = arith.constant 0 : index
    %7 = vector.load %arg4[%c0_5, %c0_6] : memref<8x64xf32, #tpu.memory_space<vmem>>, vector<8x64xf32>
    tpu.vector_store %arg4[%c0_5, %c0_6], %6 {strides = array<i32>} : memref<8x64xf32, #tpu.memory_space<vmem>>, vector<8x64xf32>,
    return
  }
  func.func @transform_0(%arg0: i32) -> (i32, i32) {
    %c0_i32 = arith.constant 0 : i32
    %c0_i32_0 = arith.constant 0 : i32
    return %arg0, %c0_i32 : i32, i32
  }
  func.func @transform_1(%arg0: i32) -> (i32, i32) {
    %c0_i32 = arith.constant 0 : i32
    %c0_i32_0 = arith.constant 0 : i32
    %c0_i32_1 = arith.constant 0 : i32
    return %c0_i32, %c0_i32_0 : i32, i32
  }
  func.func @transform_2(%arg0: i32) -> (i32, i32) {
    %c0_i32 = arith.constant 0 : i32
    %c0_i32_0 = arith.constant 0 : i32
    %c0_i32_1 = arith.constant 0 : i32
    return %c0_i32, %c0_i32_0 : i32, i32
  }
  func.func @transform_3(%arg0: i32) -> (i32, i32) {
    %c0_i32 = arith.constant 0 : i32
    %c0_i32_0 = arith.constant 0 : i32
    return %arg0, %c0_i32 : i32, i32
  }
}

</mosaic_0001>

<bundles_post_ra>
// kernel: patch_embed_spe.1
= control target key start
LH: loop header
LB: loop body
LE: loop exit
PB: predicated region body
PF: predicated region fallthrough
CT: control target
= control target key end

     0   :  { %vm112_vm0 = vcmask 1040384   ;;  %s305_s0 = inlined_call_operand.vmem [shape: f32[8,162], index: 0, kind: input, shape index: {}]   ;;  %s306_s1 = inlined_call_operand.vmem [shape: bf16[162,64], index: 1, kind: input, shape index: {}]   ;;  %s307_s2 = inlined_call_operand.vmem [shape: f32[1,64], index: 2, kind: input, shape index: {}]   ;;  %s308_s3 = inlined_call_operand.hbm [shape: f32[8,64], index: 3, kind: output, shape index: {}]  }
   0x1   :  { %v208_v0 = vld [vmem:[%s306_s1 + $0x38] sm:$0xff]  ;;  %v40_v1 = vld [vmem:[%s306_s1 + $0x50] sm:$0x1] }
   0x2   :  { %116 = vmatpush.bf16.msra.mxu0 %v208_v0  ;;  %v207_v2 = vld [vmem:[%s306_s1 + $0x30] sm:$0xff]  ;;  %v86_v3 = vunpack.c.l.b16 %v40_v1 }
   0x4   :  { %v97_v4 = vpack.c.b16 %v86_v3, %v86_v3 }
   0x5   :  { %8 = vsyncpa [#allocation3], 0  ;;  %v206_v5 = vld [vmem:[%s306_s1 + $0x28] sm:$0xff]  ;;  %v205_v8 = vld [vmem:[%s306_s1 + $0x20] sm:$0xff]  ;;  %vm108_vm1 = vcmask 277504   ;;  %s239_s13 = smov [#allocation2]  }
   0x6   :  { %117 = vmatpush.bf16.msra.mxu0 %v207_v2  ;;  %v114_v6 = vsel %vm112_vm0, %v97_v4, 0  ;;  %v210_v7 = vld [vmem:[%s306_s1 + $0x48] sm:$0xff]  ;;  %v209_v9 = vld [vmem:[%s306_s1 + $0x40] sm:$0xff]  ;;  %v204_v11 = vld [vmem:[%s306_s1 + $0x18] sm:$0xff]  ;;  %s149_s14 = sshll.u32 %s239_s13, 4  ;;  %vm142_vm2 = vcmask 523264   ;;  %s150_s14 = int_to_ptr.vmem [resolvable:$true] %s149_s14 }
   0x7   :  { %134 = vmatpush.bf16.msra.mxu1 %v114_v6  ;;  %v17_v10 = vld [vmem:[%s305_s0 + $0x8] sm:$0xff]  ;;  %v203_v13 = vld [vmem:[%s306_s1 + $0x10] sm:$0xff]  ;;  %v201_v15 = vld [vmem:[%s306_s1] sm:$0xff] }
   0x8   :  { %v19_v12 = vpack.c.bf16 %v17_v10, %v17_v10  ;;  %v202_v14 = vld [vmem:[%s306_s1 + $0x8] sm:$0xff]  ;;  %v16_v16 = vld [vmem:[%s305_s0] sm:$0xff]  ;;  %s151_s1 = sshll.u32 %s308_s3, 4  ;;  %s152_s1 = int_to_ptr.hbm [resolvable:$true] %s151_s1 }
   0x9   :  { %v18_v17 = vpack.c.bf16 %v16_v16, %v16_v16  ;;  %v212_v20 = vld [vmem:[%s307_s2] ss:$0 sm:$0xff] }
   0xa   :  { %118 = vmatpush.bf16.msra.mxu0 %v206_v5 }
   0xb   :  { %135 = vmatpush.bf16.msra.mxu1 %v210_v7 }
   0xe   :  { %119 = vmatpush.bf16.msra.mxu0 %v205_v8 }
   0xf   :  { %136 = vmatpush.bf16.msra.mxu1 %v209_v9 }
  0x12   :  { %120 = vmatpush.bf16.msra.mxu0 %v204_v11  ;;  %200 = vmatmul.msk.bf16.vlgmr.msra.gmra.mxu1 %vm108_vm1, %v19_v12 }
  0x16   :  { %121 = vmatpush.bf16.msra.mxu0 %v203_v13 }
  0x1a   :  { %122 = vmatpush.bf16.msra.mxu0 %v202_v14 }
  0x1e   :  { %123 = vmatpush.bf16.msra.mxu0 %v201_v15 }
  0x21   :  { %124 = vmatmul.bf16.vlgmr.msra.gmra.mxu0 %v18_v17 }
  0x8f   :  { %v138_v18 = vpop.f32.mrf.mxu1 }
  0x97   :  { %v140_v19 = vpop.f32.mrf.mxu1 }
  0x9e   :  { %v125_v21 = vpop.f32.mrf.mxu0 }
  0x9f   :  { %v126_v22 = vadd.f32 %v212_v20, %v125_v21 }
  0xa1   :  { %v139_v23 = vadd.f32 %v138_v18, %v126_v22 }
  0xa3   :  { %143 = vst.msk [vmem:[#allocation2] sm:$0xff] %vm142_vm2, %v139_v23 }
  0xa4   :  { %154 = dma.vmem_to_hbm [thread:$0]  %s150_s14, 128, %s152_s1, [#allocation3]  }
  0xa6   :  { %v127_v24 = vpop.f32.mrf.mxu0 }
  0xa7   :  { %237 = dma.done.wait [#allocation3], 128  }
  0xa8   :  { %238 = vsyncadd [#allocation3], 4294967168 }
  0xa9   :  { %159 = vsyncpa [#allocation3], 1 }

</bundles_post_ra>
